<compile_context>
chip_gen: v5e
topology: v5e:2x2
jax: 0.10.0
libtpu: 0.0.40
codegen_flags: <defaults>
</compile_context>

<pallas_src>
import functools
import math

import jax
import jax.numpy as jnp
from jax.experimental import pallas as pl
from jax.experimental.pallas import tpu as pltpu


def _round_up(x, m):
    return ((x + m - 1) // m) * m


# ---------------------------------------------------------------------------
# Path A: fused kernel — A is VMEM-resident, read from HBM exactly once.
# ---------------------------------------------------------------------------
def fused_gcn_kernel(a_ref, xw_ref, b1_ref, w2_ref, b2_ref, o_ref):
    # layer 1: H = relu(A @ (X W1) + b1)   (A bf16, XW1 bf16, accum f32)
    h = jnp.maximum(
        jnp.dot(a_ref[...], xw_ref[...], preferred_element_type=jnp.float32)
        + b1_ref[...], 0.0)
    # layer 2 feature transform (tiny): G = (H @ W2) -> bf16
    g = jnp.dot(h, w2_ref[...],
                preferred_element_type=jnp.float32).astype(jnp.bfloat16)
    o = jnp.dot(a_ref[...], g, preferred_element_type=jnp.float32) + b2_ref[...]
    # log_softmax(axis=-1) in f32 with max subtraction
    m = jnp.max(o, axis=-1, keepdims=True)
    z = o - m
    o_ref[...] = z - jnp.log(jnp.sum(jnp.exp(z), axis=-1, keepdims=True))


# ---------------------------------------------------------------------------
# Path B: streamed kernels for graphs whose adjacency does not fit in VMEM.
#   conv1: G = (relu(A @ XW1 + b1) @ W2) -> bf16   (P3 accumulator over k)
#   conv2: out = log_softmax(A @ G + b2)
# ---------------------------------------------------------------------------
def conv1_kernel(a_ref, xw_ref, b1_ref, w2_ref, g_ref, acc_ref):
    k = pl.program_id(1)

    @pl.when(k == 0)
    def _():
        acc_ref[...] = jnp.zeros_like(acc_ref)

    acc_ref[...] += jnp.dot(a_ref[...], xw_ref[...],
                            preferred_element_type=jnp.float32)

    @pl.when(k == pl.num_programs(1) - 1)
    def _():
        h = jnp.maximum(acc_ref[...] + b1_ref[...], 0.0)
        g_ref[...] = jnp.dot(
            h, w2_ref[...],
            preferred_element_type=jnp.float32).astype(jnp.bfloat16)


def conv2_kernel(a_ref, g_ref, b2_ref, o_ref, acc_ref):
    k = pl.program_id(1)

    @pl.when(k == 0)
    def _():
        acc_ref[...] = jnp.zeros_like(acc_ref)

    acc_ref[...] += jnp.dot(a_ref[...], g_ref[...],
                            preferred_element_type=jnp.float32)

    @pl.when(k == pl.num_programs(1) - 1)
    def _():
        o = acc_ref[...] + b2_ref[...]
        m = jnp.max(o, axis=-1, keepdims=True)
        z = o - m
        o_ref[...] = z - jnp.log(jnp.sum(jnp.exp(z), axis=-1, keepdims=True))


def _a_block_spec(tm, tk):
    """Streamed (tm, tk) A tile; triple-buffered when pipeline_mode exists."""
    idx = lambda i, k: (i, k)
    try:
        return pl.BlockSpec((tm, tk), idx, pipeline_mode=pl.Buffered(3))
    except Exception:
        # pipeline_mode / Buffered unavailable in this jax build -> default 2-deep.
        return pl.BlockSpec((tm, tk), idx)


# ------------------------------- graph glue (JAX) ---------------------------
def build_normalized_adjacency(edge_index, num_nodes, padded_nodes):
    """Dense GCN-normalized adjacency (torch_geometric gcn_norm semantics),
    scattered directly into a zero-padded (padded_nodes, padded_nodes) bf16
    buffer (single fused scatter; padded rows/cols stay exactly zero)."""
    row, col = edge_index[0], edge_index[1]
    ew = jnp.ones(row.shape[0], dtype=jnp.float32)
    # Only add self-loops to nodes that don't already have one.
    has_loop = jnp.zeros((num_nodes,), jnp.float32).at[row].max(
        jnp.where(row == col, 1.0, 0.0))
    loops = jnp.arange(num_nodes, dtype=row.dtype)
    row = jnp.concatenate([row, loops])
    col = jnp.concatenate([col, loops])
    ew = jnp.concatenate([ew, 1.0 - has_loop])

    deg = jnp.zeros((num_nodes,), jnp.float32).at[col].add(ew)
    dis = jnp.where(deg > 0, jax.lax.rsqrt(deg), 0.0)
    norm = (dis[row] * ew * dis[col]).astype(jnp.bfloat16)
    # A[i=target(col), j=source(row)] += norm
    return jnp.zeros((padded_nodes, padded_nodes),
                     jnp.bfloat16).at[col, row].add(norm)


def _choose_tiles(n, tm_req, tk_req):
    n8 = _round_up(n, 8)
    tm = max(8, min(tm_req, n8))
    tk = max(8, min(tk_req, n8))
    lcm = tm * tk // math.gcd(tm, tk)
    n_pad = _round_up(n8, lcm)
    return tm, tk, n_pad


# ---------------------------------- forward ---------------------------------
@functools.partial(jax.jit, static_argnames=("fuse_max", "tm", "tk"))
def gcn_forward(x, edge_index, params, *, fuse_max=2048, tm=512, tk=2048):
    n, _ = x.shape
    w1, b1, w2, b2 = params
    hidden = w1.shape[1]
    out_channels = w2.shape[1]

    # Hoisted feature transform: XW1 computed once, cast to bf16 (review #1).
    xw = jnp.dot(x, w1, preferred_element_type=jnp.float32).astype(jnp.bfloat16)

    if _round_up(n, 8) <= fuse_max:
        # ---------------- fused path: A VMEM-resident, one HBM sweep ---------
        n_pad = _round_up(n, 8)
        a_p = build_normalized_adjacency(edge_index, n, n_pad)
        xw_p = jnp.zeros((n_pad, hidden), jnp.bfloat16).at[:n, :].set(xw)

        out = pl.pallas_call(
            fused_gcn_kernel,
            out_shape=jax.ShapeDtypeStruct((n_pad, out_channels), jnp.float32),
            grid_spec=pltpu.PrefetchScalarGridSpec(
                num_scalar_prefetch=0,
                grid=(1,),
                in_specs=[
                    pl.BlockSpec((n_pad, n_pad), lambda i: (0, 0)),          # A
                    pl.BlockSpec((n_pad, hidden), lambda i: (0, 0)),         # XW1
                    pl.BlockSpec((1, hidden), lambda i: (0, 0)),             # b1
                    pl.BlockSpec((hidden, out_channels), lambda i: (0, 0)),  # W2
                    pl.BlockSpec((1, out_channels), lambda i: (0, 0)),       # b2
                ],
                out_specs=pl.BlockSpec((n_pad, out_channels), lambda i: (0, 0)),
            ),
            compiler_params=pltpu.CompilerParams(
                dimension_semantics=("arbitrary",),
                # Above v5e's 16 MiB scoped default; n_pad<=2048 keeps the
                # (possibly double-buffered) bf16 A well under this.
                vmem_limit_bytes=40 * 1024 * 1024),
        )(a_p, xw_p, b1, w2, b2)
        return out[:n]

    # ------------- streamed path: A tiled (tm, tk) over a 2-D grid -----------
    tm_e, tk_e, n_pad = _choose_tiles(n, tm, tk)
    a_p = build_normalized_adjacency(edge_index, n, n_pad)
    xw_p = jnp.zeros((n_pad, hidden), jnp.bfloat16).at[:n, :].set(xw)

    grid = (n_pad // tm_e, n_pad // tk_e)
    cparams = pltpu.CompilerParams(
        dimension_semantics=("parallel", "arbitrary"),
        vmem_limit_bytes=32 * 1024 * 1024)

    # conv1 (+ fused H@W2): emits G = (relu(A@XW1 + b1) @ W2) in bf16.
    g = pl.pallas_call(
        conv1_kernel,
        out_shape=jax.ShapeDtypeStruct((n_pad, out_channels), jnp.bfloat16),
        grid_spec=pltpu.PrefetchScalarGridSpec(
            num_scalar_prefetch=0,
            grid=grid,
            in_specs=[
                _a_block_spec(tm_e, tk_e),                                  # A
                pl.BlockSpec((tk_e, hidden), lambda i, k: (k, 0)),          # XW1
                pl.BlockSpec((1, hidden), lambda i, k: (0, 0)),             # b1
                pl.BlockSpec((hidden, out_channels), lambda i, k: (0, 0)),  # W2
            ],
            out_specs=pl.BlockSpec((tm_e, out_channels), lambda i, k: (i, 0)),
            scratch_shapes=[pltpu.VMEM((tm_e, hidden), jnp.float32)],
        ),
        compiler_params=cparams,
    )(a_p, xw_p, b1, w2)

    # conv2 + log_softmax: out = log_softmax(A @ G + b2).
    out = pl.pallas_call(
        conv2_kernel,
        out_shape=jax.ShapeDtypeStruct((n_pad, out_channels), jnp.float32),
        grid_spec=pltpu.PrefetchScalarGridSpec(
            num_scalar_prefetch=0,
            grid=grid,
            in_specs=[
                _a_block_spec(tm_e, tk_e),                                  # A
                pl.BlockSpec((tk_e, out_channels), lambda i, k: (k, 0)),    # G
                pl.BlockSpec((1, out_channels), lambda i, k: (0, 0)),       # b2
            ],
            out_specs=pl.BlockSpec((tm_e, out_channels), lambda i, k: (i, 0)),
            scratch_shapes=[pltpu.VMEM((tm_e, out_channels), jnp.float32)],
        ),
        compiler_params=cparams,
    )(a_p, g, b2)

    return out[:n]


# ---------------------------- reference (same precision) --------------------
def gcn_reference(x, edge_index, params):
    w1, b1, w2, b2 = params
    n = x.shape[0]
    a = build_normalized_adjacency(edge_index, n, n)                      # bf16
    xw = jnp.dot(x, w1, preferred_element_type=jnp.float32).astype(jnp.bfloat16)
    h = jnp.maximum(
        jnp.dot(a, xw, preferred_element_type=jnp.float32) + b1, 0.0)
    g = jnp.dot(h, w2, preferred_element_type=jnp.float32).astype(jnp.bfloat16)
    o = jnp.dot(a, g, preferred_element_type=jnp.float32) + b2
    return jax.nn.log_softmax(o, axis=-1)


def init_params(key, in_channels=3, hidden=16, out_channels=7):
    k1, k2, k3, k4 = jax.random.split(key, 4)
    # Glorot-style deterministic init (synthetic weights, no checkpoint load).
    w1 = jax.random.normal(k1, (in_channels, hidden), jnp.float32) * (
        2.0 / (in_channels + hidden)) ** 0.5
    b1 = jax.random.normal(k2, (1, hidden), jnp.float32) * 0.01
    w2 = jax.random.normal(k3, (hidden, out_channels), jnp.float32) * (
        2.0 / (hidden + out_channels)) ** 0.5
    b2 = jax.random.normal(k4, (1, out_channels), jnp.float32) * 0.01
    return w1, b1, w2, b2


if __name__ == "__main__":
    root = jax.random.PRNGKey(0)
    kx, kp, kx2, ke_src, ke_dst = jax.random.split(root, 5)
    params = init_params(kp)

    # ---- 1) The test fixture: 8 nodes, 3 features, chain graph (fused path) ----
    x = jax.random.normal(kx, (8, 3), jnp.float32)
    edge_index = jnp.array(
        [[0, 1, 1, 2, 2, 3, 3, 4, 4, 5, 5, 6, 6, 7],
         [1, 0, 2, 1, 3, 2, 4, 3, 5, 4, 6, 5, 7, 6]], dtype=jnp.int32)
    # batch / edge_label_index unused for the chosen node-level config.

    out = jax.block_until_ready(gcn_forward(x, edge_index, params))
    ref = gcn_reference(x, edge_index, params)
    assert out.shape == (8, 7)
    assert bool(jnp.all(jnp.isfinite(out)))
    assert bool(jnp.allclose(jnp.sum(jnp.exp(out), axis=-1), 1.0, atol=1e-3))
    assert bool(jnp.allclose(out, ref, atol=5e-3, rtol=5e-3))

    # ---- 2) Larger random graph through the fused (A VMEM-resident) path ----
    n_big = 1024
    x_big = jax.random.normal(kx2, (n_big, 3), jnp.float32)
    src = jax.random.randint(ke_src, (4096,), 0, n_big, dtype=jnp.int32)
    dst = jax.random.randint(ke_dst, (4096,), 0, n_big, dtype=jnp.int32)
    edge_big = jnp.stack([jnp.concatenate([src, dst]),
                          jnp.concatenate([dst, src])])

    out_big = jax.block_until_ready(gcn_forward(x_big, edge_big, params))
    ref_big = gcn_reference(x_big, edge_big, params)
    assert out_big.shape == (n_big, 7)
    assert bool(jnp.all(jnp.isfinite(out_big)))
    assert bool(jnp.allclose(out_big, ref_big, atol=1e-2, rtol=1e-2))

    # ---- 3) Same graph forced through the streamed / tiled multi-step grid ----
    out_str = jax.block_until_ready(
        gcn_forward(x_big, edge_big, params, fuse_max=0, tm=256, tk=512))
    assert out_str.shape == (n_big, 7)
    assert bool(jnp.all(jnp.isfinite(out_str)))
    assert bool(jnp.allclose(out_str, ref_big, atol=1e-2, rtol=1e-2))

    print("KERNEL_OK")
</pallas_src>

<mosaic_0001>
module attributes {stable_mosaic.version = 11 : i64} {
  func.func @fused_gcn_kernel(%arg0: i32, %arg1: memref<8x8xbf16, #tpu.memory_space<vmem>>, %arg2: memref<8x16xbf16, #tpu.memory_space<vmem>>, %arg3: memref<1x16xf32, #tpu.memory_space<vmem>>, %arg4: memref<16x7xf32, #tpu.memory_space<vmem>>, %arg5: memref<1x7xf32, #tpu.memory_space<vmem>>, %arg6: memref<8x7xf32, #tpu.memory_space<vmem>>) attributes {dimension_semantics = [#tpu.dimension_semantics<arbitrary>], iteration_bounds = array<i64: 1>, scalar_prefetch = 0 : i64, scratch_operands = 0 : i64, tpu.core_type = #tpu.core_type<tc>, window_params = [{pipeline_mode = #tpu.pipeline_mode<synchronous>, transform_indices = @transform_0, window_bounds = array<i64: 8, 8>}, {pipeline_mode = #tpu.pipeline_mode<synchronous>, transform_indices = @transform_1, window_bounds = array<i64: 8, 16>}, {pipeline_mode = #tpu.pipeline_mode<synchronous>, transform_indices = @transform_2, window_bounds = array<i64: 1, 16>}, {pipeline_mode = #tpu.pipeline_mode<synchronous>, transform_indices = @transform_3, window_bounds = array<i64: 16, 7>}, {pipeline_mode = #tpu.pipeline_mode<synchronous>, transform_indices = @transform_4, window_bounds = array<i64: 1, 7>}, {pipeline_mode = #tpu.pipeline_mode<synchronous>, transform_indices = @transform_5, window_bounds = array<i64: 8, 7>}]} {
    %c0 = arith.constant 0 : index
    %c0_0 = arith.constant 0 : index
    %0 = vector.load %arg1[%c0, %c0_0] : memref<8x8xbf16, #tpu.memory_space<vmem>>, vector<8x8xbf16>
    %c0_1 = arith.constant 0 : index
    %c0_2 = arith.constant 0 : index
    %1 = vector.load %arg2[%c0_1, %c0_2] : memref<8x16xbf16, #tpu.memory_space<vmem>>, vector<8x16xbf16>
    %cst = arith.constant dense<0.000000e+00> : vector<8x16xf32>
    %2 = tpu.matmul %0, %1, %cst {dimension_numbers = #tpu.dot_dimension_numbers<[1], [0], [0], [1], [0, 0, 1, 1], [], []>} : vector<8x8xbf16>, vector<8x16xbf16>, vector<8x16xf32> -> vector<8x16xf32>
    %c0_3 = arith.constant 0 : index
    %c0_4 = arith.constant 0 : index
    %3 = vector.load %arg3[%c0_3, %c0_4] : memref<1x16xf32, #tpu.memory_space<vmem>>, vector<1x16xf32>
    %4 = vector.broadcast %3 : vector<1x16xf32> to vector<8x16xf32>
    %5 = arith.addf %2, %4 : vector<8x16xf32>
    %cst_5 = arith.constant 0.000000e+00 : f32
    %6 = vector.broadcast %cst_5 : f32 to vector<8x16xf32>
    %7 = arith.maximumf %5, %6 : vector<8x16xf32>
    %c0_6 = arith.constant 0 : index
    %c0_7 = arith.constant 0 : index
    %8 = vector.load %arg4[%c0_6, %c0_7] : memref<16x7xf32, #tpu.memory_space<vmem>>, vector<16x7xf32>
    %cst_8 = arith.constant dense<0.000000e+00> : vector<8x7xf32>
    %9 = tpu.matmul %7, %8, %cst_8 {dimension_numbers = #tpu.dot_dimension_numbers<[1], [0], [0], [1], [0, 0, 1, 1], [], []>} : vector<8x16xf32>, vector<16x7xf32>, vector<8x7xf32> -> vector<8x7xf32>
    %10 = arith.truncf %9 : vector<8x7xf32> to vector<8x7xbf16>
    %c0_9 = arith.constant 0 : index
    %c0_10 = arith.constant 0 : index
    %11 = vector.load %arg1[%c0_9, %c0_10] : memref<8x8xbf16, #tpu.memory_space<vmem>>, vector<8x8xbf16>
    %cst_11 = arith.constant dense<0.000000e+00> : vector<8x7xf32>
    %12 = tpu.matmul %11, %10, %cst_11 {dimension_numbers = #tpu.dot_dimension_numbers<[1], [0], [0], [1], [0, 0, 1, 1], [], []>} : vector<8x8xbf16>, vector<8x7xbf16>, vector<8x7xf32> -> vector<8x7xf32>
    %c0_12 = arith.constant 0 : index
    %c0_13 = arith.constant 0 : index
    %13 = vector.load %arg5[%c0_12, %c0_13] : memref<1x7xf32, #tpu.memory_space<vmem>>, vector<1x7xf32>
    %14 = vector.broadcast %13 : vector<1x7xf32> to vector<8x7xf32>
    %15 = arith.addf %12, %14 : vector<8x7xf32>
    %cst_14 = arith.constant dense<0xFF800000> : vector<8xf32>
    %16 = vector.multi_reduction <maximumf>, %15, %cst_14 [1] : vector<8x7xf32> to vector<8xf32>
    %17 = vector.shape_cast %16 : vector<8xf32> to vector<8x1xf32>
    %18 = vector.broadcast %17 : vector<8x1xf32> to vector<8x7xf32>
    %19 = arith.subf %15, %18 : vector<8x7xf32>
    %20 = math.exp %19 : vector<8x7xf32>
    %cst_15 = arith.constant dense<0.000000e+00> : vector<8xf32>
    %21 = vector.multi_reduction <add>, %20, %cst_15 [1] : vector<8x7xf32> to vector<8xf32>
    %22 = vector.shape_cast %21 : vector<8xf32> to vector<8x1xf32>
    %23 = math.log %22 : vector<8x1xf32>
    %24 = vector.broadcast %23 : vector<8x1xf32> to vector<8x7xf32>
    %25 = arith.subf %19, %24 : vector<8x7xf32>
    %c0_16 = arith.constant 0 : index
    %c0_17 = arith.constant 0 : index
    %26 = vector.load %arg6[%c0_16, %c0_17] : memref<8x7xf32, #tpu.memory_space<vmem>>, vector<8x7xf32>
    tpu.vector_store %arg6[%c0_16, %c0_17], %25 {strides = array<i32>} : memref<8x7xf32, #tpu.memory_space<vmem>>, vector<8x7xf32>,
    return
  }
  func.func @transform_0(%arg0: i32) -> (i32, i32) {
    %c0_i32 = arith.constant 0 : i32
    %c0_i32_0 = arith.constant 0 : i32
    %c0_i32_1 = arith.constant 0 : i32
    return %c0_i32, %c0_i32_0 : i32, i32
  }
  func.func @transform_1(%arg0: i32) -> (i32, i32) {
    %c0_i32 = arith.constant 0 : i32
    %c0_i32_0 = arith.constant 0 : i32
    %c0_i32_1 = arith.constant 0 : i32
    return %c0_i32, %c0_i32_0 : i32, i32
  }
  func.func @transform_2(%arg0: i32) -> (i32, i32) {
    %c0_i32 = arith.constant 0 : i32
    %c0_i32_0 = arith.constant 0 : i32
    %c0_i32_1 = arith.constant 0 : i32
    return %c0_i32, %c0_i32_0 : i32, i32
  }
  func.func @transform_3(%arg0: i32) -> (i32, i32) {
    %c0_i32 = arith.constant 0 : i32
    %c0_i32_0 = arith.constant 0 : i32
    %c0_i32_1 = arith.constant 0 : i32
    return %c0_i32, %c0_i32_0 : i32, i32
  }
  func.func @transform_4(%arg0: i32) -> (i32, i32) {
    %c0_i32 = arith.constant 0 : i32
    %c0_i32_0 = arith.constant 0 : i32
    %c0_i32_1 = arith.constant 0 : i32
    return %c0_i32, %c0_i32_0 : i32, i32
  }
  func.func @transform_5(%arg0: i32) -> (i32, i32) {
    %c0_i32 = arith.constant 0 : i32
    %c0_i32_0 = arith.constant 0 : i32
    %c0_i32_1 = arith.constant 0 : i32
    return %c0_i32, %c0_i32_0 : i32, i32
  }
}

</mosaic_0001>

<bundles_post_ra>
// kernel: gcn_forward.1
= control target key start
LH: loop header
LB: loop body
LE: loop exit
PB: predicated region body
PF: predicated region fallthrough
CT: control target
= control target key end

     0   :  { %vm32_vm0 = vcmask 1043456   ;;  %vm28_vm1 = vcmask 64512   ;;  %s222_s0 = inlined_call_operand.vmem [shape: bf16[8,8], index: 0, kind: input, shape index: {}]   ;;  %s223_s1 = inlined_call_operand.vmem [shape: bf16[8,16], index: 1, kind: input, shape index: {}]   ;;  %s224_s2 = inlined_call_operand.vmem [shape: f32[1,16], index: 2, kind: input, shape index: {}]   ;;  %s225_s3 = inlined_call_operand.vmem [shape: f32[16,7], index: 3, kind: input, shape index: {}]   ;;  %s226_s4 = inlined_call_operand.vmem [shape: f32[1,7], index: 4, kind: input, shape index: {}]   ;;  %s227_s5 = inlined_call_operand.hbm [shape: f32[8,7], index: 5, kind: output, shape index: {}]  }
   0x1   :  { %v23_v0 = vld [vmem:[%s223_s1] sm:$0xf] }
   0x2   :  { %v34_v1 = vsel %vm32_vm0, %v23_v0, 0  ;;  %v22_v2 = vld [vmem:[%s222_s0] sm:$0xf] }
   0x3   :  { %43 = vmatpush.bf16.msra.mxu0 %v34_v1 }
   0x4   :  { %10 = vsyncpa [#allocation3], 0  ;;  %v51_v3 = vld [vmem:[%s225_s3 + $0x8] sm:$0xff]  ;;  %v50_v4 = vld [vmem:[%s225_s3] sm:$0xff]  ;;  %vm52_vm2 = vcmask 130048   ;;  %vm97_vm3 = vcmask 56320  }
   0x5   :  { %70 = vmatpush.msra.mxu1 %v51_v3  ;;  %v131_v5 = vld [vmem:[%s224_s2] ss:$0 sm:$0xff]  ;;  %s163_s2 = smov [#allocation2]   ;;  %s118_s29 = sshll.u32 %s227_s5, 4  ;;  %s119_s29 = int_to_ptr.hbm [resolvable:$true] %s118_s29 }
   0x6   :  { %127 = vmatmul.msk.bf16.vlgmr.msra.gmra.mxu0 %vm28_vm1, %v22_v2  ;;  %v132_v13 = vld [vmem:[%s226_s4] ss:$0 sm:$0xff]  ;;  %s116_s4 = sshll.u32 %s163_s2, 4  ;;  %s117_s4 = int_to_ptr.vmem [resolvable:$true] %s116_s4 }
   0x7   :  { %71 = vmatpush.msra.mxu1 %v50_v4 }
  0x83   :  { %v45_v6 = vpop.f32.mrf.mxu0 }
  0x84   :  { %v46_v7 = vadd.f32 %v131_v5, %v45_v6 }
  0x86   :  { %v49_v8 = vmax.f32 %v46_v7, 0.0 }
  0x88   :  { %128 = vmatmul.msk.f32.vlgmr.msra.gmra.mxu1 %vm52_vm2, %v49_v8 }
  0x8b   :  { %v47_v9 = vpop.f32.mrf.mxu0 }
 0x105   :  { %v73_v10 = vpop.f32.mrf.mxu1 }
 0x106   :  { %v76_v11 = vpack.c.bf16 %v73_v10, %v73_v10 }
 0x108   :  { %v82_v12 = vsel %vm32_vm0, %v76_v11, 0 }
 0x109   :  { %91 = vmatpush.bf16.msra.mxu2 %v82_v12 }
 0x10c   :  { %129 = vmatmul.msk.bf16.vlgmr.msra.gmra.mxu2 %vm28_vm1, %v22_v2 }
 0x18f   :  { %v93_v14 = vpop.f32.mrf.mxu2 }
 0x190   :  { %v94_v15 = vadd.f32 %v132_v13, %v93_v14 }
 0x192   :  { %v98_v16 = vsel %vm97_vm3, %v94_v15, -inf }
 0x193   :  { %99 = vmax.xlane.f32.xlu0 %v98_v16 }
 0x197   :  { %v95_v17 = vpop.f32.mrf.mxu2 }
 0x206   :  { %v100_v18 = vpop.xlane.xlu0 %99 }
 0x207   :  { %v101_v19 = vsub.f32 %v94_v15, %v100_v18 }
 0x209   :  { %v102_v20 = vmul.f32 1.442695, %v101_v19 }
 0x20b   :  { %133 = vpow2.f32 %v102_v20 }
 0x211   :  { %v134_v21 = vpop.eup %133 }
 0x212   :  { %v104_v22 = vsel %vm97_vm3, %v134_v21, 0.0 }
 0x213   :  { %105 = vadd.xlane.f32.xlu0 %v104_v22 }
 0x286   :  { %v106_v23 = vpop.xlane.xlu0 %105 }
 0x287   :  { %135 = vlog2.f32 %v106_v23 }
 0x28d   :  { %v136_v24 = vpop.eup %135 }
 0x28e   :  { %v108_v25 = vmul.f32 0.6931472, %v136_v24 }
 0x290   :  { %v109_v26 = vsub.f32 %v101_v19, %v108_v25 }
 0x292   :  { %110 = vst.msk [vmem:[#allocation2] sm:$0xff] %vm97_vm3, %v109_v26 }
 0x293   :  { %121 = dma.vmem_to_hbm [thread:$0]  %s117_s4, 128, %s119_s29, [#allocation3]  }
 0x294   :  { %161 = dma.done.wait [#allocation3], 128  }
 0x295   :  { %162 = vsyncadd [#allocation3], 4294967168 }
 0x296   :  { %126 = vsyncpa [#allocation3], 1 }

</bundles_post_ra>
